<compile_context>
chip_gen: v6e
topology: v6e:2x2x1
jax: 0.10.0
libtpu: 0.0.40
codegen_flags: <defaults>
</compile_context>

<pallas_src>
import functools

import jax
import jax.numpy as jnp
from jax.experimental import pallas as pl
from jax.experimental.pallas import tpu as pltpu

IN_FEATURES = 8
HIDDEN = 128
N_STACK = 5  # fc2..fc6 stacked; fc1 (8->128) and fc7 (128->n_out) kept separate


def _round_up(n, m):
    return ((n + m - 1) // m) * m


def decoder_basic_kernel(x_ref, w1_ref, b1_ref, wh_ref, bh_ref, w7_ref, b7_ref,
                         o_ref):
    # x_ref : (TM, 8)        f32   batch tile
    # w1_ref: (8, 128)       bf16  } resident in VMEM (constant index_map)
    # b1_ref: (1, 128)       f32   }
    # wh_ref: (5, 128, 128)  bf16  }
    # bh_ref: (5, 1, 128)    f32   }
    # w7_ref: (128, n_out)   bf16  }
    # b7_ref: (1, n_out)     f32   }
    # o_ref : (TM, n_out)    f32   softmax probabilities
    h = jnp.dot(x_ref[...].astype(jnp.bfloat16), w1_ref[...],
                preferred_element_type=jnp.float32)
    h = jnp.maximum(h + b1_ref[...], 0.0)

    for i in range(N_STACK):  # static unroll: MXU chain + VPU bias/ReLU
        h = jnp.dot(h.astype(jnp.bfloat16), wh_ref[i],
                    preferred_element_type=jnp.float32)
        h = jnp.maximum(h + bh_ref[i], 0.0)

    logits = jnp.dot(h.astype(jnp.bfloat16), w7_ref[...],
                     preferred_element_type=jnp.float32) + b7_ref[...]

    # softmax over last axis == PyTorch dim=1 for 2-D input; exact divide so
    # rows sum to 1 to f32 precision.
    m = jnp.max(logits, axis=-1, keepdims=True)
    e = jnp.exp(logits - m)
    denom = jnp.sum(e, axis=-1, keepdims=True)
    o_ref[...] = (e / denom).astype(o_ref.dtype)


def pack_params(params):
    """One-time parameter packing.  Call OUTSIDE the per-step forward."""
    w1, b1 = params[0]
    w1p = jnp.asarray(w1, jnp.bfloat16)                               # (8,128)
    b1p = jnp.asarray(b1, jnp.float32).reshape(1, HIDDEN)             # (1,128)
    wh = jnp.stack([w for (w, _) in params[1:6]]).astype(jnp.bfloat16)  # (5,128,128)
    bh = jnp.stack([jnp.asarray(b, jnp.float32).reshape(1, HIDDEN)
                    for (_, b) in params[1:6]])                       # (5,1,128)
    w7, b7 = params[6]
    w7p = jnp.asarray(w7, jnp.bfloat16)                               # (128,n_out)
    b7p = jnp.asarray(b7, jnp.float32).reshape(1, -1)                 # (1,n_out)
    return (w1p, b1p, wh, bh, w7p, b7p)


@jax.jit
def decoder_basic_forward(x, packed):
    w1p, b1p, wh, bh, w7p, b7p = packed
    B, in_features = x.shape
    n_out = w7p.shape[1]

    # ---- batch tiling (static at trace time) ----
    B8 = _round_up(B, 8)
    if B8 <= 16:
        TM = B8                                        # single tiny block
    else:
        TM = min(512, _round_up(-(-B8 // 2), 8))       # >=2 blocks when possible
    B_pad = _round_up(B8, TM)
    n_blocks = B_pad // TM

    xp = x.astype(jnp.float32)
    if B_pad != B:
        xp = jnp.pad(xp, ((0, B_pad - B), (0, 0)))

    flops = 2 * B_pad * (in_features * HIDDEN
                         + N_STACK * HIDDEN * HIDDEN
                         + HIDDEN * n_out)
    bytes_accessed = (xp.size * 4 + B_pad * n_out * 4
                      + wh.size * 2 + bh.size * 4 + w1p.size * 2
                      + b1p.size * 4 + w7p.size * 2 + b7p.size * 4)

    out = pl.pallas_call(
        decoder_basic_kernel,
        out_shape=jax.ShapeDtypeStruct((B_pad, n_out), jnp.float32),
        grid_spec=pltpu.PrefetchScalarGridSpec(
            num_scalar_prefetch=0,
            grid=(n_blocks,),
            in_specs=[
                # x: last block dim (8) == full array dim -> legal, no padding
                pl.BlockSpec((TM, in_features), lambda i: (i, 0)),
                # constant block index => weights/biases stay resident in VMEM
                pl.BlockSpec((in_features, HIDDEN), lambda i: (0, 0)),
                pl.BlockSpec((1, HIDDEN), lambda i: (0, 0)),
                pl.BlockSpec((N_STACK, HIDDEN, HIDDEN), lambda i: (0, 0, 0)),
                pl.BlockSpec((N_STACK, 1, HIDDEN), lambda i: (0, 0, 0)),
                pl.BlockSpec((HIDDEN, n_out), lambda i: (0, 0)),
                pl.BlockSpec((1, n_out), lambda i: (0, 0)),
            ],
            # output last dim == full array dim (number_outputs) -> legal
            out_specs=pl.BlockSpec((TM, n_out), lambda i: (i, 0)),
        ),
        compiler_params=pltpu.CompilerParams(
            dimension_semantics=("parallel",)),
        cost_estimate=pl.CostEstimate(
            flops=flops,
            transcendentals=B_pad * n_out,
            bytes_accessed=bytes_accessed),
    )(xp, w1p, b1p, wh, bh, w7p, b7p)

    return out[:B]


def init_params(key, number_outputs):
    """Deterministic init mirroring the nn.Linear shapes of Decoder_Basic."""
    dims = [(IN_FEATURES, HIDDEN)] + [(HIDDEN, HIDDEN)] * 5 + [(HIDDEN, number_outputs)]
    params = []
    for fan_in, fan_out in dims:
        kw, kb, key = jax.random.split(key, 3)
        bound = 1.0 / jnp.sqrt(fan_in)
        # stored as (in, out): equivalent to PyTorch weight (out, in) transposed
        w = jax.random.uniform(kw, (fan_in, fan_out), jnp.float32, -bound, bound)
        b = jax.random.uniform(kb, (fan_out,), jnp.float32, -bound, bound)
        params.append((w, b))
    return params


def reference_forward(x, params):
    """Pure-JAX reference mirroring the kernel's bf16-operand / f32-accum dots."""
    h = x
    for (w, b) in params[:-1]:
        h = jnp.dot(h.astype(jnp.bfloat16), w.astype(jnp.bfloat16),
                    preferred_element_type=jnp.float32) + b
        h = jnp.maximum(h, 0.0)
    w, b = params[-1]
    logits = jnp.dot(h.astype(jnp.bfloat16), w.astype(jnp.bfloat16),
                     preferred_element_type=jnp.float32) + b
    return jax.nn.softmax(logits, axis=1)


if __name__ == "__main__":
    number_outputs = 4
    key = jax.random.PRNGKey(0)
    kx, kp, kx2 = jax.random.split(key, 3)
    params = init_params(kp, number_outputs)
    packed = pack_params(params)   # one-time packing, outside the hot path

    # Small batch (single grid step)
    x_small = jax.random.normal(kx, (8, IN_FEATURES), jnp.float32)
    out_small = jax.block_until_ready(decoder_basic_forward(x_small, packed))
    ref_small = reference_forward(x_small, params)
    assert out_small.shape == (8, number_outputs)
    assert jnp.allclose(out_small, ref_small, atol=2e-3), "mismatch vs reference (B=8)"
    assert jnp.allclose(jnp.sum(out_small, axis=1), 1.0, atol=1e-5), "rows must sum to 1"

    # Larger, non-aligned batch (exercises multi-block grid + batch padding)
    x_big = jax.random.normal(kx2, (260, IN_FEATURES), jnp.float32)
    out_big = jax.block_until_ready(decoder_basic_forward(x_big, packed))
    ref_big = reference_forward(x_big, params)
    assert out_big.shape == (260, number_outputs)
    assert jnp.allclose(out_big, ref_big, atol=2e-3), "mismatch vs reference (B=260)"
    assert jnp.allclose(jnp.sum(out_big, axis=1), 1.0, atol=1e-5), "rows must sum to 1"

    print("KERNEL_OK")
</pallas_src>

<mosaic_0001>
module attributes {stable_mosaic.version = 11 : i64} {
  func.func @decoder_basic_kernel(%arg0: i32, %arg1: memref<8x8xf32, #tpu.memory_space<vmem>>, %arg2: memref<8x128xbf16, #tpu.memory_space<vmem>>, %arg3: memref<1x128xf32, #tpu.memory_space<vmem>>, %arg4: memref<5x128x128xbf16, #tpu.memory_space<vmem>>, %arg5: memref<5x1x128xf32, #tpu.memory_space<vmem>>, %arg6: memref<128x4xbf16, #tpu.memory_space<vmem>>, %arg7: memref<1x4xf32, #tpu.memory_space<vmem>>, %arg8: memref<8x4xf32, #tpu.memory_space<vmem>>) attributes {dimension_semantics = [#tpu.dimension_semantics<parallel>], iteration_bounds = array<i64: 1>, scalar_prefetch = 0 : i64, scratch_operands = 0 : i64, tpu.core_type = #tpu.core_type<tc>, window_params = [{transform_indices = @transform_0, window_bounds = array<i64: 8, 8>}, {pipeline_mode = #tpu.pipeline_mode<synchronous>, transform_indices = @transform_1, window_bounds = array<i64: 8, 128>}, {pipeline_mode = #tpu.pipeline_mode<synchronous>, transform_indices = @transform_2, window_bounds = array<i64: 1, 128>}, {pipeline_mode = #tpu.pipeline_mode<synchronous>, transform_indices = @transform_3, window_bounds = array<i64: 5, 128, 128>}, {pipeline_mode = #tpu.pipeline_mode<synchronous>, transform_indices = @transform_4, window_bounds = array<i64: 5, 1, 128>}, {pipeline_mode = #tpu.pipeline_mode<synchronous>, transform_indices = @transform_5, window_bounds = array<i64: 128, 4>}, {pipeline_mode = #tpu.pipeline_mode<synchronous>, transform_indices = @transform_6, window_bounds = array<i64: 1, 4>}, {transform_indices = @transform_7, window_bounds = array<i64: 8, 4>}]} {
    %c0 = arith.constant 0 : index
    %c0_0 = arith.constant 0 : index
    %0 = vector.load %arg1[%c0, %c0_0] : memref<8x8xf32, #tpu.memory_space<vmem>>, vector<8x8xf32>
    %1 = arith.truncf %0 : vector<8x8xf32> to vector<8x8xbf16>
    %c0_1 = arith.constant 0 : index
    %c0_2 = arith.constant 0 : index
    %2 = vector.load %arg2[%c0_1, %c0_2] : memref<8x128xbf16, #tpu.memory_space<vmem>>, vector<8x128xbf16>
    %cst = arith.constant dense<0.000000e+00> : vector<8x128xf32>
    %3 = tpu.matmul %1, %2, %cst {dimension_numbers = #tpu.dot_dimension_numbers<[1], [0], [0], [1], [0, 0, 1, 1], [], []>} : vector<8x8xbf16>, vector<8x128xbf16>, vector<8x128xf32> -> vector<8x128xf32>
    %c0_3 = arith.constant 0 : index
    %c0_4 = arith.constant 0 : index
    %4 = vector.load %arg3[%c0_3, %c0_4] : memref<1x128xf32, #tpu.memory_space<vmem>>, vector<1x128xf32>
    %5 = vector.broadcast %4 : vector<1x128xf32> to vector<8x128xf32>
    %6 = arith.addf %3, %5 : vector<8x128xf32>
    %cst_5 = arith.constant 0.000000e+00 : f32
    %7 = vector.broadcast %cst_5 : f32 to vector<8x128xf32>
    %8 = arith.maximumf %6, %7 : vector<8x128xf32>
    %9 = arith.truncf %8 : vector<8x128xf32> to vector<8x128xbf16>
    %c0_6 = arith.constant 0 : index
    %c0_7 = arith.constant 0 : index
    %c0_8 = arith.constant 0 : index
    %10 = vector.load %arg4[%c0_6, %c0_7, %c0_8] : memref<5x128x128xbf16, #tpu.memory_space<vmem>>, vector<1x128x128xbf16>
    %11 = vector.shape_cast %10 : vector<1x128x128xbf16> to vector<128x128xbf16>
    %cst_9 = arith.constant dense<0.000000e+00> : vector<8x128xf32>
    %12 = tpu.matmul %9, %11, %cst_9 {dimension_numbers = #tpu.dot_dimension_numbers<[1], [0], [0], [1], [0, 0, 1, 1], [], []>} : vector<8x128xbf16>, vector<128x128xbf16>, vector<8x128xf32> -> vector<8x128xf32>
    %c0_10 = arith.constant 0 : index
    %c0_11 = arith.constant 0 : index
    %c0_12 = arith.constant 0 : index
    %13 = vector.load %arg5[%c0_10, %c0_11, %c0_12] : memref<5x1x128xf32, #tpu.memory_space<vmem>>, vector<1x1x128xf32>
    %14 = vector.shape_cast %13 : vector<1x1x128xf32> to vector<1x128xf32>
    %15 = vector.broadcast %14 : vector<1x128xf32> to vector<8x128xf32>
    %16 = arith.addf %12, %15 : vector<8x128xf32>
    %cst_13 = arith.constant 0.000000e+00 : f32
    %17 = vector.broadcast %cst_13 : f32 to vector<8x128xf32>
    %18 = arith.maximumf %16, %17 : vector<8x128xf32>
    %19 = arith.truncf %18 : vector<8x128xf32> to vector<8x128xbf16>
    %c1 = arith.constant 1 : index
    %c0_14 = arith.constant 0 : index
    %c0_15 = arith.constant 0 : index
    %20 = vector.load %arg4[%c1, %c0_14, %c0_15] : memref<5x128x128xbf16, #tpu.memory_space<vmem>>, vector<1x128x128xbf16>
    %21 = vector.shape_cast %20 : vector<1x128x128xbf16> to vector<128x128xbf16>
    %cst_16 = arith.constant dense<0.000000e+00> : vector<8x128xf32>
    %22 = tpu.matmul %19, %21, %cst_16 {dimension_numbers = #tpu.dot_dimension_numbers<[1], [0], [0], [1], [0, 0, 1, 1], [], []>} : vector<8x128xbf16>, vector<128x128xbf16>, vector<8x128xf32> -> vector<8x128xf32>
    %c1_17 = arith.constant 1 : index
    %c0_18 = arith.constant 0 : index
    %c0_19 = arith.constant 0 : index
    %23 = vector.load %arg5[%c1_17, %c0_18, %c0_19] : memref<5x1x128xf32, #tpu.memory_space<vmem>>, vector<1x1x128xf32>
    %24 = vector.shape_cast %23 : vector<1x1x128xf32> to vector<1x128xf32>
    %25 = vector.broadcast %24 : vector<1x128xf32> to vector<8x128xf32>
    %26 = arith.addf %22, %25 : vector<8x128xf32>
    %cst_20 = arith.constant 0.000000e+00 : f32
    %27 = vector.broadcast %cst_20 : f32 to vector<8x128xf32>
    %28 = arith.maximumf %26, %27 : vector<8x128xf32>
    %29 = arith.truncf %28 : vector<8x128xf32> to vector<8x128xbf16>
    %c2 = arith.constant 2 : index
    %c0_21 = arith.constant 0 : index
    %c0_22 = arith.constant 0 : index
    %30 = vector.load %arg4[%c2, %c0_21, %c0_22] : memref<5x128x128xbf16, #tpu.memory_space<vmem>>, vector<1x128x128xbf16>
    %31 = vector.shape_cast %30 : vector<1x128x128xbf16> to vector<128x128xbf16>
    %cst_23 = arith.constant dense<0.000000e+00> : vector<8x128xf32>
    %32 = tpu.matmul %29, %31, %cst_23 {dimension_numbers = #tpu.dot_dimension_numbers<[1], [0], [0], [1], [0, 0, 1, 1], [], []>} : vector<8x128xbf16>, vector<128x128xbf16>, vector<8x128xf32> -> vector<8x128xf32>
    %c2_24 = arith.constant 2 : index
    %c0_25 = arith.constant 0 : index
    %c0_26 = arith.constant 0 : index
    %33 = vector.load %arg5[%c2_24, %c0_25, %c0_26] : memref<5x1x128xf32, #tpu.memory_space<vmem>>, vector<1x1x128xf32>
    %34 = vector.shape_cast %33 : vector<1x1x128xf32> to vector<1x128xf32>
    %35 = vector.broadcast %34 : vector<1x128xf32> to vector<8x128xf32>
    %36 = arith.addf %32, %35 : vector<8x128xf32>
    %cst_27 = arith.constant 0.000000e+00 : f32
    %37 = vector.broadcast %cst_27 : f32 to vector<8x128xf32>
    %38 = arith.maximumf %36, %37 : vector<8x128xf32>
    %39 = arith.truncf %38 : vector<8x128xf32> to vector<8x128xbf16>
    %c3 = arith.constant 3 : index
    %c0_28 = arith.constant 0 : index
    %c0_29 = arith.constant 0 : index
    %40 = vector.load %arg4[%c3, %c0_28, %c0_29] : memref<5x128x128xbf16, #tpu.memory_space<vmem>>, vector<1x128x128xbf16>
    %41 = vector.shape_cast %40 : vector<1x128x128xbf16> to vector<128x128xbf16>
    %cst_30 = arith.constant dense<0.000000e+00> : vector<8x128xf32>
    %42 = tpu.matmul %39, %41, %cst_30 {dimension_numbers = #tpu.dot_dimension_numbers<[1], [0], [0], [1], [0, 0, 1, 1], [], []>} : vector<8x128xbf16>, vector<128x128xbf16>, vector<8x128xf32> -> vector<8x128xf32>
    %c3_31 = arith.constant 3 : index
    %c0_32 = arith.constant 0 : index
    %c0_33 = arith.constant 0 : index
    %43 = vector.load %arg5[%c3_31, %c0_32, %c0_33] : memref<5x1x128xf32, #tpu.memory_space<vmem>>, vector<1x1x128xf32>
    %44 = vector.shape_cast %43 : vector<1x1x128xf32> to vector<1x128xf32>
    %45 = vector.broadcast %44 : vector<1x128xf32> to vector<8x128xf32>
    %46 = arith.addf %42, %45 : vector<8x128xf32>
    %cst_34 = arith.constant 0.000000e+00 : f32
    %47 = vector.broadcast %cst_34 : f32 to vector<8x128xf32>
    %48 = arith.maximumf %46, %47 : vector<8x128xf32>
    %49 = arith.truncf %48 : vector<8x128xf32> to vector<8x128xbf16>
    %c4 = arith.constant 4 : index
    %c0_35 = arith.constant 0 : index
    %c0_36 = arith.constant 0 : index
    %50 = vector.load %arg4[%c4, %c0_35, %c0_36] : memref<5x128x128xbf16, #tpu.memory_space<vmem>>, vector<1x128x128xbf16>
    %51 = vector.shape_cast %50 : vector<1x128x128xbf16> to vector<128x128xbf16>
    %cst_37 = arith.constant dense<0.000000e+00> : vector<8x128xf32>
    %52 = tpu.matmul %49, %51, %cst_37 {dimension_numbers = #tpu.dot_dimension_numbers<[1], [0], [0], [1], [0, 0, 1, 1], [], []>} : vector<8x128xbf16>, vector<128x128xbf16>, vector<8x128xf32> -> vector<8x128xf32>
    %c4_38 = arith.constant 4 : index
    %c0_39 = arith.constant 0 : index
    %c0_40 = arith.constant 0 : index
    %53 = vector.load %arg5[%c4_38, %c0_39, %c0_40] : memref<5x1x128xf32, #tpu.memory_space<vmem>>, vector<1x1x128xf32>
    %54 = vector.shape_cast %53 : vector<1x1x128xf32> to vector<1x128xf32>
    %55 = vector.broadcast %54 : vector<1x128xf32> to vector<8x128xf32>
    %56 = arith.addf %52, %55 : vector<8x128xf32>
    %cst_41 = arith.constant 0.000000e+00 : f32
    %57 = vector.broadcast %cst_41 : f32 to vector<8x128xf32>
    %58 = arith.maximumf %56, %57 : vector<8x128xf32>
    %59 = arith.truncf %58 : vector<8x128xf32> to vector<8x128xbf16>
    %c0_42 = arith.constant 0 : index
    %c0_43 = arith.constant 0 : index
    %60 = vector.load %arg6[%c0_42, %c0_43] : memref<128x4xbf16, #tpu.memory_space<vmem>>, vector<128x4xbf16>
    %cst_44 = arith.constant dense<0.000000e+00> : vector<8x4xf32>
    %61 = tpu.matmul %59, %60, %cst_44 {dimension_numbers = #tpu.dot_dimension_numbers<[1], [0], [0], [1], [0, 0, 1, 1], [], []>} : vector<8x128xbf16>, vector<128x4xbf16>, vector<8x4xf32> -> vector<8x4xf32>
    %c0_45 = arith.constant 0 : index
    %c0_46 = arith.constant 0 : index
    %62 = vector.load %arg7[%c0_45, %c0_46] : memref<1x4xf32, #tpu.memory_space<vmem>>, vector<1x4xf32>
    %63 = vector.broadcast %62 : vector<1x4xf32> to vector<8x4xf32>
    %64 = arith.addf %61, %63 : vector<8x4xf32>
    %cst_47 = arith.constant dense<0xFF800000> : vector<8xf32>
    %65 = vector.multi_reduction <maximumf>, %64, %cst_47 [1] : vector<8x4xf32> to vector<8xf32>
    %66 = vector.shape_cast %65 : vector<8xf32> to vector<8x1xf32>
    %67 = vector.broadcast %66 : vector<8x1xf32> to vector<8x4xf32>
    %68 = arith.subf %64, %67 : vector<8x4xf32>
    %69 = math.exp %68 : vector<8x4xf32>
    %cst_48 = arith.constant dense<0.000000e+00> : vector<8xf32>
    %70 = vector.multi_reduction <add>, %69, %cst_48 [1] : vector<8x4xf32> to vector<8xf32>
    %71 = vector.shape_cast %70 : vector<8xf32> to vector<8x1xf32>
    %72 = vector.broadcast %71 : vector<8x1xf32> to vector<8x4xf32>
    %73 = arith.divf %69, %72 : vector<8x4xf32>
    %c0_49 = arith.constant 0 : index
    %c0_50 = arith.constant 0 : index
    %74 = vector.load %arg8[%c0_49, %c0_50] : memref<8x4xf32, #tpu.memory_space<vmem>>, vector<8x4xf32>
    tpu.vector_store %arg8[%c0_49, %c0_50], %73 {strides = array<i32>} : memref<8x4xf32, #tpu.memory_space<vmem>>, vector<8x4xf32>,
    return
  }
  func.func @transform_0(%arg0: i32) -> (i32, i32) {
    %c0_i32 = arith.constant 0 : i32
    %c0_i32_0 = arith.constant 0 : i32
    return %arg0, %c0_i32 : i32, i32
  }
  func.func @transform_1(%arg0: i32) -> (i32, i32) {
    %c0_i32 = arith.constant 0 : i32
    %c0_i32_0 = arith.constant 0 : i32
    %c0_i32_1 = arith.constant 0 : i32
    return %c0_i32, %c0_i32_0 : i32, i32
  }
  func.func @transform_2(%arg0: i32) -> (i32, i32) {
    %c0_i32 = arith.constant 0 : i32
    %c0_i32_0 = arith.constant 0 : i32
    %c0_i32_1 = arith.constant 0 : i32
    return %c0_i32, %c0_i32_0 : i32, i32
  }
  func.func @transform_3(%arg0: i32) -> (i32, i32, i32) {
    %c0_i32 = arith.constant 0 : i32
    %c0_i32_0 = arith.constant 0 : i32
    %c0_i32_1 = arith.constant 0 : i32
    %c0_i32_2 = arith.constant 0 : i32
    return %c0_i32, %c0_i32_0, %c0_i32_1 : i32, i32, i32
  }
  func.func @transform_4(%arg0: i32) -> (i32, i32, i32) {
    %c0_i32 = arith.constant 0 : i32
    %c0_i32_0 = arith.constant 0 : i32
    %c0_i32_1 = arith.constant 0 : i32
    %c0_i32_2 = arith.constant 0 : i32
    return %c0_i32, %c0_i32_0, %c0_i32_1 : i32, i32, i32
  }
  func.func @transform_5(%arg0: i32) -> (i32, i32) {
    %c0_i32 = arith.constant 0 : i32
    %c0_i32_0 = arith.constant 0 : i32
    %c0_i32_1 = arith.constant 0 : i32
    return %c0_i32, %c0_i32_0 : i32, i32
  }
  func.func @transform_6(%arg0: i32) -> (i32, i32) {
    %c0_i32 = arith.constant 0 : i32
    %c0_i32_0 = arith.constant 0 : i32
    %c0_i32_1 = arith.constant 0 : i32
    return %c0_i32, %c0_i32_0 : i32, i32
  }
  func.func @transform_7(%arg0: i32) -> (i32, i32) {
    %c0_i32 = arith.constant 0 : i32
    %c0_i32_0 = arith.constant 0 : i32
    return %arg0, %c0_i32 : i32, i32
  }
}

</mosaic_0001>

<bundles_post_ra>
// kernel: decoder_basic_forward.1
= control target key start
LH: loop header
LB: loop body
LE: loop exit
PB: predicated region body
PF: predicated region fallthrough
CT: control target
= control target key end

     0   :  { %12 = vsyncpa [#allocation3], 0  ;;  %s1124_s24 = smov [#allocation2]   ;;  %s1292_s0 = inlined_call_operand.vmem [shape: f32[8,8], index: 0, kind: input, shape index: {}]   ;;  %s1293_s1 = inlined_call_operand.vmem [shape: bf16[8,128], index: 1, kind: input, shape index: {}]   ;;  %s1294_s2 = inlined_call_operand.vmem [shape: f32[1,128], index: 2, kind: input, shape index: {}]   ;;  %s1295_s3 = inlined_call_operand.hbm [shape: bf16[5,128,128], index: 3, kind: input, shape index: {}]   ;;  %s1296_s4 = inlined_call_operand.vmem [shape: f32[5,1,128], index: 4, kind: input, shape index: {}]   ;;  %s1297_s5 = inlined_call_operand.vmem [shape: bf16[128,4], index: 5, kind: input, shape index: {}]   ;;  %s1298_s6 = inlined_call_operand.vmem [shape: f32[1,4], index: 6, kind: input, shape index: {}]   ;;  %s1299_s7 = inlined_call_operand.vmem [shape: f32[8,4], index: 7, kind: output, shape index: {}]  }
   0x1   :  { %s24_s25 = sshll.u32 %s1124_s24, 4  ;;  %s25_s25 = int_to_ptr.vmem [resolvable:$true] %s24_s25 }
   0x2   :  { %s1110_s26 = scalar_lea.vmem %s25_s25, 5120  ;;  %p1115_p1 = scmp.lt.s32.totalorder %s25_s25, %s25_s25 }
   0x3   :  { %p1111_p0 = scmp.ne.s32.totalorder %s25_s25, %s1110_s26  ;;  %p1116_p2 = scmp.lt.s32.totalorder %s1110_s26, %s1110_s26 }
   0x5   :  { %p1117_p3 = por %p1116_p2, %p1115_p1 }
   0x7   :  { %p1118_p4 = pnand %p1117_p3, %p1111_p0 }
   0x9   :  { %1121 = shalt.err (!%p1118_p4)
}
   0xa   :  { %s1125_s27 = smov 64   ;;  %s1126_s28 = smov 4  }
   0xb   :  { %30 = dma.hbm_to_vmem [thread:$0]  %s1295_s3, 5120, %s25_s25, [#allocation3], %s1125_s27, %s1125_s27, %s1126_s28  }
   0xc   :  { %1122 = dma.done.wait [#allocation3], 5120  }
   0xd   :  { %1123 = vsyncadd [#allocation3], 4294962176  ;;  %v1127_v0 = vmov 0.0   ;;  %vm1128_vm0 = vmmov 0   ;;  %vm55_vm1 = vcmask 1043456   ;;  %v41_v2 = vld [vmem:[%s1292_s0] sm:$0xff] }
   0xe   :  { %919 = vmatprep.subr.bf16.mxu0 %v1127_v0  ;;  %921 = vmatprep.mubr.msk.bf16.mxu0 %vm1128_vm0, %v1127_v0  ;;  %v43_v1 = vld [vmem:[%s1293_s1] sm:$0xf]  ;;  %v42_v4 = vpack.c.bf16 %v41_v2, %v41_v2  ;;  %v1050_v5 = vld [vmem:[#allocation2 + $0x38] sm:$0xff]   ;;  %vm51_vm2 = vcmask 64512   ;;  %v1051_v6 = vld [vmem:[#allocation2 + $0x30] sm:$0xff]   ;;  %vm785_vm3 = vcmask 31744  }
   0xf   :  { %925 = vmatprep.subr.bf16.mxu1 %v1127_v0  ;;  %941 = vmatprep.mubr.msk.bf16.mxu1 %vm1128_vm0, %v1127_v0  ;;  %v57_v3 = vsel %vm55_vm1, %v43_v1, 0  ;;  %v1052_v7 = vld [vmem:[#allocation2 + $0x28] sm:$0xff]   ;;  %v1053_v8 = vld [vmem:[#allocation2 + $0x20] sm:$0xff]   ;;  %v1054_v9 = vld [vmem:[#allocation2 + $0x18] sm:$0xff]  }
  0x10   :  { %920 = vmatpush3.bf16.msra.mxu0 %v57_v3  ;;  %926 = vmatpush3.bf16.msra.mxu1 %v1050_v5  ;;  %v1055_v10 = vld [vmem:[#allocation2 + $0x10] sm:$0xff]   ;;  %v1056_v11 = vld [vmem:[#allocation2 + $0x8] sm:$0xff]   ;;  %v1057_v12 = vld [vmem:[#allocation2] sm:$0xff]  }
  0x11   :  { %945 = vmatprep.subr.bf16.mxu0 %v1127_v0  ;;  %927 = vmatprep.subr.bf16.mxu1 %v1127_v0  ;;  %v1058_v13 = vld [vmem:[#allocation2 + $0x78] sm:$0xff]   ;;  %v1059_v14 = vld [vmem:[#allocation2 + $0x70] sm:$0xff]   ;;  %v1060_v15 = vld [vmem:[#allocation2 + $0x68] sm:$0xff]  }
  0x12   :  { %v1061_v16 = vld [vmem:[#allocation2 + $0x60] sm:$0xff]   ;;  %v1062_v17 = vld [vmem:[#allocation2 + $0x58] sm:$0xff]   ;;  %v1063_v18 = vld [vmem:[#allocation2 + $0x50] sm:$0xff]  }
  0x13   :  { %922 = vmatmul.mubr.msk.bf16.vlgmr.msra.gmra.mxu0 %vm51_vm2, %v42_v4  ;;  %v803_v19 = vld [vmem:[%s1294_s2] ss:$0 sm:$0xff]  ;;  %v1064_v27 = vld [vmem:[#allocation2 + $0x48] sm:$0xff]   ;;  %v1066_v29 = vld [vmem:[#allocation2 + $0xb8] sm:$0xff]  }
  0x14   :  { %961 = vmatprep.mubr.msk.bf16.mxu0 %vm1128_vm0, %v1127_v0  ;;  %928 = vmatpush3.bf16.msra.mxu1 %v1051_v6  ;;  %v1065_v28 = vld [vmem:[#allocation2 + $0x40] sm:$0xff]   ;;  %v1067_v30 = vld [vmem:[#allocation2 + $0xb0] sm:$0xff]   ;;  %v1068_v31 = vld [vmem:[#allocation2 + $0xa8] sm:$0xff]  }
  0x15   :  { %929 = vmatprep.subr.bf16.mxu1 %v1127_v0  ;;  %946 = vmatpush3.bf16.msra.mxu0 %v1058_v13  ;;  %v1069_v32 = vld [vmem:[#allocation2 + $0xa0] sm:$0xff]   ;;  %v1070_v33 = vld [vmem:[#allocation2 + $0x98] sm:$0xff]   ;;  %v1071_v34 = vld [vmem:[#allocation2 + $0x90] sm:$0xff]  }
  0x16   :  { %947 = vmatprep.subr.bf16.mxu0 %v1127_v0  ;;  %v805_v35 = vld [vmem:[%s1296_s4] ss:$0 sm:$0xff]  ;;  %v1072_v43 = vld [vmem:[#allocation2 + $0x88] sm:$0xff]   ;;  %v1074_v45 = vld [vmem:[#allocation2 + $0xf8] sm:$0xff]  }
  0x17   :  { %v1073_v44 = vld [vmem:[#allocation2 + $0x80] sm:$0xff]   ;;  %v1075_v46 = vld [vmem:[#allocation2 + $0xf0] sm:$0xff]   ;;  %v1076_v47 = vld [vmem:[#allocation2 + $0xe8] sm:$0xff]  }
  0x18   :  { %930 = vmatpush3.bf16.msra.mxu1 %v1052_v7  ;;  %v1077_v48 = vld [vmem:[#allocation2 + $0xe0] sm:$0xff]   ;;  %v1078_v49 = vld [vmem:[#allocation2 + $0xd8] sm:$0xff]   ;;  %v1079_v50 = vld [vmem:[#allocation2 + $0xd0] sm:$0xff]  }
  0x19   :  { %931 = vmatprep.subr.bf16.mxu1 %v1127_v0  ;;  %948 = vmatpush3.bf16.msra.mxu0 %v1059_v14  ;;  %v815_v51 = vld [vmem:[%s1296_s4 + $0x1] ss:$0 sm:$0xff]  ;;  %v1080_v59 = vld [vmem:[#allocation2 + $0xc8] sm:$0xff]   ;;  %v1082_v61 = vld [vmem:[#allocation2 + $0x138] sm:$0xff]  }
  0x1a   :  { %949 = vmatprep.subr.bf16.mxu0 %v1127_v0  ;;  %v1081_v60 = vld [vmem:[#allocation2 + $0xc0] sm:$0xff]   ;;  %v1083_v62 = vld [vmem:[#allocation2 + $0x130] sm:$0xff]   ;;  %v1084_v63 = vld [vmem:[#allocation2 + $0x128] sm:$0xff]  }
  0x1b   :  { %v1085_v1 = vld [vmem:[#allocation2 + $0x120] sm:$0xff]   ;;  %v1086_v2 = vld [vmem:[#allocation2 + $0x118] sm:$0xff]   ;;  %v1087_v3 = vld [vmem:[#allocation2 + $0x110] sm:$0xff]  }
  0x1c   :  { %932 = vmatpush3.bf16.msra.mxu1 %v1053_v8  ;;  %v825_v4 = vld [vmem:[%s1296_s4 + $0x2] ss:$0 sm:$0xff]  ;;  %v1090_v14 = vld [vmem:[%s1297_s5 + $0x38] sm:$0xff]  }
  0x1d   :  { %933 = vmatprep.subr.bf16.mxu1 %v1127_v0  ;;  %950 = vmatpush3.bf16.msra.mxu0 %v1060_v15  ;;  %v1089_v13 = vld [vmem:[#allocation2 + $0x100] sm:$0xff]   ;;  %v1091_v15 = vld [vmem:[%s1297_s5 + $0x30] sm:$0xff]  }
  0x1e   :  { %951 = vmatprep.subr.bf16.mxu0 %v1127_v0 }
  0x20   :  { %934 = vmatpush3.bf16.msra.mxu1 %v1054_v9 }
  0x21   :  { %935 = vmatprep.subr.bf16.mxu1 %v1127_v0  ;;  %952 = vmatpush3.bf16.msra.mxu0 %v1061_v16  ;;  %v1092_v16 = vld [vmem:[%s1297_s5 + $0x28] sm:$0xff]  }
  0x22   :  { %953 = vmatprep.subr.bf16.mxu0 %v1127_v0 }
  0x24   :  { %936 = vmatpush3.bf16.msra.mxu1 %v1055_v10 }
  0x25   :  { %937 = vmatprep.subr.bf16.mxu1 %v1127_v0  ;;  %954 = vmatpush3.bf16.msra.mxu0 %v1062_v17  ;;  %v1093_v17 = vld [vmem:[%s1297_s5 + $0x20] sm:$0xff]  }
  0x26   :  { %955 = vmatprep.subr.bf16.mxu0 %v1127_v0 }
  0x28   :  { %938 = vmatpush3.bf16.msra.mxu1 %v1056_v11 }
  0x29   :  { %939 = vmatprep.subr.bf16.mxu1 %v1127_v0  ;;  %956 = vmatpush3.bf16.msra.mxu0 %v1063_v18  ;;  %v1094_v18 = vld [vmem:[%s1297_s5 + $0x18] sm:$0xff]  }
  0x2a   :  { %957 = vmatprep.subr.bf16.mxu0 %v1127_v0 }
  0x2c   :  { %940 = vmatpush3.bf16.msra.mxu1 %v1057_v12  ;;  %v1088_v12 = vld [vmem:[#allocation2 + $0x108] sm:$0xff]  }
  0x2d   :  { %965 = vmatprep.subr.bf16.mxu1 %v1127_v0  ;;  %958 = vmatpush3.bf16.msra.mxu0 %v1064_v27 }
  0x2e   :  { %959 = vmatprep.subr.bf16.mxu0 %v1127_v0 }
  0x31   :  { %960 = vmatpush3.bf16.msra.mxu0 %v1065_v28  ;;  %v1096_v28 = vld [vmem:[%s1297_s5 + $0x8] sm:$0xff]  }
  0x32   :  { %985 = vmatprep.subr.bf16.mxu0 %v1127_v0 }
  0xd3   :  { %v93_v20 = vpop.f32.mrf.mxu0 }
  0xd4   :  { %v94_v21 = vadd.f32 %v803_v19, %v93_v20  ;;  %v1095_v19 = vld [vmem:[%s1297_s5 + $0x10] sm:$0xff]   ;;  %v835_v20 = vld [vmem:[%s1296_s4 + $0x3] ss:$0 sm:$0xff] }
  0xd5   :  { %v923_v22 = vpop.f32.mrf.mxu0 }
  0xd6   :  { %v99_v23 = vmax.f32 %v94_v21, 0.0 }
  0xd7   :  { %v96_v24 = vpop.f32.mrf.mxu0 }
  0xd8   :  { %v100_v25 = vpack.c.bf16 %v99_v23, %v99_v23 }
  0xd9   :  { %v924_v26 = vpop.f32.mrf.mxu0 }
  0xda   :  { %942 = vmatmul.mubr.bf16.vlgmr.msra.gmra.mxu1 %v100_v25 }
  0xdb   :  { %981 = vmatprep.mubr.msk.bf16.mxu1 %vm1128_vm0, %v1127_v0  ;;  %966 = vmatpush3.bf16.msra.mxu1 %v1066_v29  ;;  %v1097_v29 = vld [vmem:[%s1297_s5] sm:$0xff]  }
  0xdc   :  { %967 = vmatprep.subr.bf16.mxu1 %v1127_v0 }
  0xdf   :  { %968 = vmatpush3.bf16.msra.mxu1 %v1067_v30  ;;  %v845_v30 = vld [vmem:[%s1296_s4 + $0x4] ss:$0 sm:$0xff] }
  0xe0   :  { %969 = vmatprep.subr.bf16.mxu1 %v1127_v0 }
  0xe3   :  { %970 = vmatpush3.bf16.msra.mxu1 %v1068_v31 }
  0xe4   :  { %971 = vmatprep.subr.bf16.mxu1 %v1127_v0 }
  0xe7   :  { %972 = vmatpush3.bf16.msra.mxu1 %v1069_v32 }
  0xe8   :  { %973 = vmatprep.subr.bf16.mxu1 %v1127_v0 }
  0xeb   :  { %974 = vmatpush3.bf16.msra.mxu1 %v1070_v33 }
  0xec   :  { %975 = vmatprep.subr.bf16.mxu1 %v1127_v0 }
  0xef   :  { %976 = vmatpush3.bf16.msra.mxu1 %v1071_v34 }
  0xf0   :  { %977 = vmatprep.subr.bf16.mxu1 %v1127_v0 }
  0xf3   :  { %978 = vmatpush3.bf16.msra.mxu1 %v1072_v43 }
  0xf4   :  { %979 = vmatprep.subr.bf16.mxu1 %v1127_v0 }
  0xf7   :  { %980 = vmatpush3.bf16.msra.mxu1 %v1073_v44 }
  0xf8   :  { %1005 = vmatprep.subr.bf16.mxu1 %v1127_v0 }
 0x19a   :  { %v206_v36 = vpop.f32.mrf.mxu1 }
 0x19b   :  { %v207_v37 = vadd.f32 %v805_v35, %v206_v36 }
 0x19c   :  { %v943_v38 = vpop.f32.mrf.mxu1 }
 0x19d   :  { %v212_v39 = vmax.f32 %v207_v37, 0.0 }
 0x19e   :  { %v209_v40 = vpop.f32.mrf.mxu1 }
 0x19f   :  { %v213_v41 = vpack.c.bf16 %v212_v39, %v212_v39 }
 0x1a0   :  { %v944_v42 = vpop.f32.mrf.mxu1 }
 0x1a1   :  { %962 = vmatmul.mubr.bf16.vlgmr.msra.gmra.mxu0 %v213_v41 }
 0x1a2   :  { %1001 = vmatprep.mubr.msk.bf16.mxu0 %vm1128_vm0, %v1127_v0  ;;  %986 = vmatpush3.bf16.msra.mxu0 %v1074_v45 }
 0x1a3   :  { %987 = vmatprep.subr.bf16.mxu0 %v1127_v0 }
 0x1a6   :  { %988 = vmatpush3.bf16.msra.mxu0 %v1075_v46 }
 0x1a7   :  { %989 = vmatprep.subr.bf16.mxu0 %v1127_v0 }
 0x1aa   :  { %990 = vmatpush3.bf16.msra.mxu0 %v1076_v47 }
 0x1ab   :  { %991 = vmatprep.subr.bf16.mxu0 %v1127_v0 }
 0x1ae   :  { %992 = vmatpush3.bf16.msra.mxu0 %v1077_v48 }
 0x1af   :  { %993 = vmatprep.subr.bf16.mxu0 %v1127_v0 }
 0x1b2   :  { %994 = vmatpush3.bf16.msra.mxu0 %v1078_v49 }
 0x1b3   :  { %995 = vmatprep.subr.bf16.mxu0 %v1127_v0 }
 0x1b6   :  { %996 = vmatpush3.bf16.msra.mxu0 %v1079_v50 }
 0x1b7   :  { %997 = vmatprep.subr.bf16.mxu0 %v1127_v0 }
 0x1ba   :  { %998 = vmatpush3.bf16.msra.mxu0 %v1080_v59 }
 0x1bb   :  { %999 = vmatprep.subr.bf16.mxu0 %v1127_v0 }
 0x1be   :  { %1000 = vmatpush3.bf16.msra.mxu0 %v1081_v60 }
 0x1bf   :  { %1025 = vmatprep.subr.bf16.mxu0 %v1127_v0 }
 0x261   :  { %v321_v52 = vpop.f32.mrf.mxu0 }
 0x262   :  { %v322_v53 = vadd.f32 %v815_v51, %v321_v52 }
 0x263   :  { %v963_v54 = vpop.f32.mrf.mxu0 }
 0x264   :  { %v327_v55 = vmax.f32 %v322_v53, 0.0 }
 0x265   :  { %v324_v56 = vpop.f32.mrf.mxu0 }
 0x266   :  { %v328_v57 = vpack.c.bf16 %v327_v55, %v327_v55 }
 0x267   :  { %v964_v58 = vpop.f32.mrf.mxu0 }
 0x268   :  { %982 = vmatmul.mubr.bf16.vlgmr.msra.gmra.mxu1 %v328_v57 }
 0x269   :  { %1021 = vmatprep.mubr.msk.bf16.mxu1 %vm1128_vm0, %v1127_v0  ;;  %1006 = vmatpush3.bf16.msra.mxu1 %v1082_v61 }
 0x26a   :  { %1007 = vmatprep.subr.bf16.mxu1 %v1127_v0 }
 0x26d   :  { %1008 = vmatpush3.bf16.msra.mxu1 %v1083_v62 }
 0x26e   :  { %1009 = vmatprep.subr.bf16.mxu1 %v1127_v0 }
 0x271   :  { %1010 = vmatpush3.bf16.msra.mxu1 %v1084_v63 }
 0x272   :  { %1011 = vmatprep.subr.bf16.mxu1 %v1127_v0 }
 0x275   :  { %1012 = vmatpush3.bf16.msra.mxu1 %v1085_v1 }
 0x276   :  { %1013 = vmatprep.subr.bf16.mxu1 %v1127_v0 }
 0x279   :  { %1014 = vmatpush3.bf16.msra.mxu1 %v1086_v2 }
 0x27a   :  { %1015 = vmatprep.subr.bf16.mxu1 %v1127_v0 }
 0x27d   :  { %1016 = vmatpush3.bf16.msra.mxu1 %v1087_v3 }
 0x27e   :  { %1017 = vmatprep.subr.bf16.mxu1 %v1127_v0 }
 0x281   :  { %1018 = vmatpush3.bf16.msra.mxu1 %v1088_v12 }
 0x282   :  { %1019 = vmatprep.subr.bf16.mxu1 %v1127_v0 }
 0x285   :  { %1020 = vmatpush3.bf16.msra.mxu1 %v1089_v13 }
 0x328   :  { %v436_v5 = vpop.f32.mrf.mxu1 }
 0x329   :  { %v437_v6 = vadd.f32 %v825_v4, %v436_v5 }
 0x32a   :  { %v983_v7 = vpop.f32.mrf.mxu1 }
 0x32b   :  { %v442_v8 = vmax.f32 %v437_v6, 0.0 }
 0x32c   :  { %v439_v9 = vpop.f32.mrf.mxu1 }
 0x32d   :  { %v443_v10 = vpack.c.bf16 %v442_v8, %v442_v8 }
 0x32e   :  { %v984_v11 = vpop.f32.mrf.mxu1 }
 0x32f   :  { %1002 = vmatmul.mubr.bf16.vlgmr.msra.gmra.mxu0 %v443_v10 }
 0x330   :  { %1041 = vmatprep.mubr.msk.bf16.mxu0 %vm1128_vm0, %v1127_v0  ;;  %1026 = vmatpush3.bf16.msra.mxu0 %v1090_v14 }
 0x331   :  { %1027 = vmatprep.subr.bf16.mxu0 %v1127_v0 }
 0x334   :  { %1028 = vmatpush3.bf16.msra.mxu0 %v1091_v15 }
 0x335   :  { %1029 = vmatprep.subr.bf16.mxu0 %v1127_v0 }
 0x338   :  { %1030 = vmatpush3.bf16.msra.mxu0 %v1092_v16 }
 0x339   :  { %1031 = vmatprep.subr.bf16.mxu0 %v1127_v0 }
 0x33c   :  { %1032 = vmatpush3.bf16.msra.mxu0 %v1093_v17 }
 0x33d   :  { %1033 = vmatprep.subr.bf16.mxu0 %v1127_v0 }
 0x340   :  { %1034 = vmatpush3.bf16.msra.mxu0 %v1094_v18 }
 0x341   :  { %1035 = vmatprep.subr.bf16.mxu0 %v1127_v0 }
 0x344   :  { %1036 = vmatpush3.bf16.msra.mxu0 %v1095_v19 }
 0x345   :  { %1037 = vmatprep.subr.bf16.mxu0 %v1127_v0 }
 0x348   :  { %1038 = vmatpush3.bf16.msra.mxu0 %v1096_v28 }
 0x349   :  { %1039 = vmatprep.subr.bf16.mxu0 %v1127_v0  ;;  %v854_v0 = vld [vmem:[%s1298_s6] ss:$0 sm:$0xff] }
 0x34c   :  { %1040 = vmatpush3.bf16.msra.mxu0 %v1097_v29 }
 0x3ef   :  { %v551_v21 = vpop.f32.mrf.mxu0 }
 0x3f0   :  { %v552_v22 = vadd.f32 %v835_v20, %v551_v21 }
 0x3f1   :  { %v1003_v23 = vpop.f32.mrf.mxu0 }
 0x3f2   :  { %v557_v24 = vmax.f32 %v552_v22, 0.0 }
 0x3f3   :  { %v554_v25 = vpop.f32.mrf.mxu0 }
 0x3f4   :  { %v558_v26 = vpack.c.bf16 %v557_v24, %v557_v24 }
 0x3f5   :  { %v1004_v27 = vpop.f32.mrf.mxu0 }
 0x3f6   :  { %1022 = vmatmul.mubr.bf16.vlgmr.msra.gmra.mxu1 %v558_v26 }
 0x4b6   :  { %v666_v31 = vpop.f32.mrf.mxu1 }
 0x4b7   :  { %v667_v32 = vadd.f32 %v845_v30, %v666_v31 }
 0x4b8   :  { %v1023_v33 = vpop.f32.mrf.mxu1 }
 0x4b9   :  { %v672_v34 = vmax.f32 %v667_v32, 0.0 }
 0x4ba   :  { %v669_v35 = vpop.f32.mrf.mxu1 }
 0x4bb   :  { %v673_v36 = vpack.c.bf16 %v672_v34, %v672_v34 }
 0x4bc   :  { %v1024_v37 = vpop.f32.mrf.mxu1 }
 0x4bd   :  { %1042 = vmatmul.mubr.bf16.vlgmr.msra.gmra.mxu0 %v673_v36 }
 0x57d   :  { %v779_v38 = vpop.f32.mrf.mxu0 }
 0x57e   :  { %v780_v39 = vadd.f32 %v854_v0, %v779_v38 }
 0x57f   :  { %v1043_v40 = vpop.f32.mrf.mxu0 }
 0x580   :  { %v786_v41 = vsel %vm785_vm3, %v780_v39, -inf }
 0x581   :  { %787 = vmax.xlane.f32.xlu0 %v786_v41  ;;  %v782_v42 = vpop.f32.mrf.mxu0 }
 0x583   :  { %v1044_v43 = vpop.f32.mrf.mxu0 }
 0x60a   :  { %v788_v44 = vpop.xlane.xlu0 %787 }
 0x60b   :  { %v789_v45 = vsub.f32 %v780_v39, %v788_v44 }
 0x60d   :  { %v790_v46 = vmul.f32 1.442695, %v789_v45 }
 0x60f   :  { %1098 = vpow2.f32 %v790_v46 }
 0x61c   :  { %v1099_v47 = vpop.eup %1098 }
 0x61d   :  { %v792_v48 = vsel %vm785_vm3, %v1099_v47, 0.0 }
 0x61e   :  { %793 = vadd.xlane.f32.xlu0 %v792_v48 }
 0x6a7   :  { %v794_v49 = vpop.xlane.xlu0 %793 }
 0x6a8   :  { %1100 = vrcp.f32 %v794_v49 }
 0x6b5   :  { %v1101_v50 = vpop.eup %1100 }
 0x6b6   :  { %v796_v51 = vmul.f32 %v1101_v50, %v1099_v47 }
 0x6b8   :  { %797 = vst.msk [vmem:[%s1299_s7] sm:$0xff] %vm785_vm3, %v796_v51 }
 0x6b9   :  { %802 = vsyncpa [#allocation3], 1 }

</bundles_post_ra>
